<compile_context>
chip_gen: v7x
topology: tpu7x:2x2x1
jax: 0.10.0
libtpu: 0.0.40
codegen_flags: <defaults>
</compile_context>

<pallas_src>
import functools

import jax
import jax.numpy as jnp
from jax.experimental import pallas as pl
from jax.experimental.pallas import tpu as pltpu


# ---------------------------------------------------------------------------
# Single-pass kernel: whole (Bn, C, HWp) slab resident per grid step.
# ---------------------------------------------------------------------------
def _ca_kernel_fused(x_ref, w1t_ref, b1_ref, w2t_ref, b2_ref, o_ref, *, inv_hw):
    x = x_ref[...].astype(jnp.float32)                       # (Bn, C, HWp)
    # AdaptiveAvgPool2d(1): padded lanes are zero, so divide by the true HW.
    pooled = jnp.sum(x, axis=-1) * inv_hw                    # (Bn, C)  lane-major
    # 1x1 convs on the pooled vector == small lane-major matmuls.
    h = jnp.dot(pooled, w1t_ref[...],
                preferred_element_type=jnp.float32) + b1_ref[...]   # (Bn, Cr)
    h = jnp.where(h >= 0, h, 0.2 * h)                        # LeakyReLU(0.2)
    y = jnp.dot(h, w2t_ref[...],
                preferred_element_type=jnp.float32) + b2_ref[...]   # (Bn, C)
    gate = jax.nn.sigmoid(y)                                 # (Bn, C)
    o_ref[...] = (x * gate[:, :, None]).astype(o_ref.dtype)


# ---------------------------------------------------------------------------
# Two-pass HW-tiled kernel.  grid = (batch, phase, hw_tile).
#   phase 0: accumulate per-channel sums across HW tiles; at the last tile
#            compute the sigmoid gate into the scratch.
#   phase 1: re-walk HW tiles, multiply by the gate, write the output.
# ---------------------------------------------------------------------------
def _ca_kernel_tiled(x_ref, w1t_ref, b1_ref, w2t_ref, b2_ref, o_ref, acc_ref,
                     *, inv_hw):
    p = pl.program_id(1)
    t = pl.program_id(2)
    nt = pl.num_programs(2)

    @pl.when(jnp.logical_and(p == 0, t == 0))
    def _():
        acc_ref[...] = jnp.zeros_like(acc_ref)

    @pl.when(p == 0)
    def _():
        acc_ref[...] += jnp.sum(x_ref[...].astype(jnp.float32), axis=-1)

    @pl.when(jnp.logical_and(p == 0, t == nt - 1))
    def _():
        pooled = acc_ref[...] * inv_hw                                   # (1, C)
        h = jnp.dot(pooled, w1t_ref[...],
                    preferred_element_type=jnp.float32) + b1_ref[...]
        h = jnp.where(h >= 0, h, 0.2 * h)
        y = jnp.dot(h, w2t_ref[...],
                    preferred_element_type=jnp.float32) + b2_ref[...]
        acc_ref[...] = jax.nn.sigmoid(y)                                 # gate

    @pl.when(p == 1)
    def _():
        x = x_ref[...].astype(jnp.float32)
        o_ref[...] = (x * acc_ref[...][:, :, None]).astype(o_ref.dtype)


# ---------------------------------------------------------------------------
# Wrapper.
# ---------------------------------------------------------------------------
def ca_layer(x_nchw, w1, b1, w2, b2, *, max_block_bytes=24 * 1024 * 1024):
    N, C, H, W = x_nchw.shape
    HW = H * W
    Cr = w1.shape[0]
    itemsize = int(jnp.dtype(x_nchw.dtype).itemsize)

    # Lane-major parameter layout (the "many" axis on lanes).
    w1t = jnp.asarray(w1).T               # (C, Cr)
    w2t = jnp.asarray(w2).T               # (Cr, C)
    b1r = jnp.asarray(b1).reshape(1, Cr)
    b2r = jnp.asarray(b2).reshape(1, C)
    weight_bytes = int((w1t.size + w2t.size + b1r.size + b2r.size) * itemsize)

    # Keep the output last dim lane-dense: pad HW up to a multiple of 128.
    HWp = ((HW + 127) // 128) * 128
    inv_hw = 1.0 / float(HW)
    per_image = C * HWp * itemsize        # bytes of one (C, HWp) slab

    x = x_nchw.reshape(N, C, HW)

    if 4 * per_image <= max_block_bytes:
        # ---------------- fused single-pass path -------------------------
        max_by_vmem = max(1, max_block_bytes // (4 * per_image))
        cap = max(1, N // 2)              # keep >= 2 parallel steps for v7x
        limit = min(max_by_vmem, cap)
        Bn = 1
        for d in range(1, N + 1):
            if N % d == 0 and d <= limit:
                Bn = d
        nb = N // Bn

        if HWp != HW:
            x = jnp.pad(x, ((0, 0), (0, 0), (0, HWp - HW)))

        block_bytes = Bn * per_image
        vmem_limit = int(min(60 * 2**20,
                             max(16 * 2**20,
                                 5 * block_bytes + weight_bytes + 2 * 2**20)))
        cost = pl.CostEstimate(
            flops=2 * N * C * HWp + 4 * N * C * Cr,
            transcendentals=N * C,
            bytes_accessed=2 * N * C * HWp * itemsize + weight_bytes,
        )

        out = pl.pallas_call(
            functools.partial(_ca_kernel_fused, inv_hw=inv_hw),
            out_shape=jax.ShapeDtypeStruct((N, C, HWp), x.dtype),
            grid_spec=pltpu.PrefetchScalarGridSpec(
                num_scalar_prefetch=0,
                grid=(nb,),
                in_specs=[
                    pl.BlockSpec((Bn, C, HWp), lambda b: (b, 0, 0)),
                    pl.BlockSpec((C, Cr), lambda b: (0, 0)),
                    pl.BlockSpec((1, Cr), lambda b: (0, 0)),
                    pl.BlockSpec((Cr, C), lambda b: (0, 0)),
                    pl.BlockSpec((1, C), lambda b: (0, 0)),
                ],
                out_specs=pl.BlockSpec((Bn, C, HWp), lambda b: (b, 0, 0)),
            ),
            compiler_params=pltpu.CompilerParams(
                dimension_semantics=("parallel",),
                vmem_limit_bytes=vmem_limit,
            ),
            cost_estimate=cost,
        )(x, w1t, b1r, w2t, b2r)
    else:
        # ---------------- two-pass HW-tiled path --------------------------
        thw = max(128, (max_block_bytes // (4 * C * itemsize)) // 128 * 128)
        thw = min(thw, HWp)
        T = -(-HWp // thw)                # ceil
        HWp2 = T * thw

        if HWp2 != HW:
            x = jnp.pad(x, ((0, 0), (0, 0), (0, HWp2 - HW)))

        block_bytes = C * thw * itemsize
        vmem_limit = int(min(60 * 2**20,
                             max(16 * 2**20,
                                 5 * block_bytes + weight_bytes + 2 * 2**20)))
        cost = pl.CostEstimate(
            flops=3 * N * C * HWp2 + 4 * N * C * Cr,
            transcendentals=N * C,
            bytes_accessed=3 * N * C * HWp2 * itemsize + weight_bytes,
        )

        out = pl.pallas_call(
            functools.partial(_ca_kernel_tiled, inv_hw=inv_hw),
            out_shape=jax.ShapeDtypeStruct((N, C, HWp2), x.dtype),
            grid_spec=pltpu.PrefetchScalarGridSpec(
                num_scalar_prefetch=0,
                grid=(N, 2, T),
                in_specs=[
                    pl.BlockSpec((1, C, thw), lambda b, p, t: (b, 0, t)),
                    pl.BlockSpec((C, Cr), lambda b, p, t: (0, 0)),
                    pl.BlockSpec((1, Cr), lambda b, p, t: (0, 0)),
                    pl.BlockSpec((Cr, C), lambda b, p, t: (0, 0)),
                    pl.BlockSpec((1, C), lambda b, p, t: (0, 0)),
                ],
                # During the pooling phase (p == 0) the output block index is
                # pinned at tile 0, so no HBM writeback happens until phase 1
                # writes each tile exactly once.
                out_specs=pl.BlockSpec((1, C, thw),
                                       lambda b, p, t: (b, 0, p * t)),
                scratch_shapes=[pltpu.VMEM((1, C), jnp.float32)],
            ),
            compiler_params=pltpu.CompilerParams(
                dimension_semantics=("parallel", "arbitrary", "arbitrary"),
                vmem_limit_bytes=vmem_limit,
            ),
            cost_estimate=cost,
        )(x, w1t, b1r, w2t, b2r)

    out = out[:, :, :HW]
    return out.reshape(N, C, H, W)


def ca_layer_ref(x, w1, b1, w2, b2):
    # Pure-JAX reference for correctness check.
    pooled = jnp.mean(x, axis=(2, 3))                           # (N, C)
    h = pooled @ w1.T + b1[:, 0]                                # (N, C//r)
    h = jnp.where(h >= 0, h, 0.2 * h)
    y = h @ w2.T + b2[:, 0]                                     # (N, C)
    y = jax.nn.sigmoid(y)
    return x * y[:, :, None, None]


if __name__ == "__main__":
    nf = 64          # channels (must be divisible by reduction)
    reduction = 16
    hidden = nf // reduction
    N, H, W = 2, 16, 16

    key = jax.random.PRNGKey(0)
    kx, k1, k2, k3, k4 = jax.random.split(key, 5)

    x = jax.random.normal(kx, (N, nf, H, W), dtype=jnp.float32)
    w1 = 0.1 * jax.random.normal(k1, (hidden, nf), dtype=jnp.float32)
    b1 = 0.1 * jax.random.normal(k2, (hidden, 1), dtype=jnp.float32)
    w2 = 0.1 * jax.random.normal(k3, (nf, hidden), dtype=jnp.float32)
    b2 = 0.1 * jax.random.normal(k4, (nf, 1), dtype=jnp.float32)

    ref = ca_layer_ref(x, w1, b1, w2, b2)

    # 1) fused single-pass path (HW = 256 is lane-aligned, slab fits VMEM).
    out = jax.block_until_ready(ca_layer(x, w1, b1, w2, b2))
    assert out.shape == (N, nf, H, W)
    assert jnp.allclose(out, ref, atol=1e-5, rtol=1e-5)

    # 2) two-pass HW-tiled path (forced via a tiny VMEM block budget).
    out_t = jax.block_until_ready(
        ca_layer(x, w1, b1, w2, b2, max_block_bytes=192 * 1024))
    assert jnp.allclose(out_t, ref, atol=1e-5, rtol=1e-5)

    # 3) non-128-aligned spatial size exercises the lane-padding path.
    H2 = W2 = 10
    x2 = jax.random.normal(kx, (N, nf, H2, W2), dtype=jnp.float32)
    ref2 = ca_layer_ref(x2, w1, b1, w2, b2)
    out2 = jax.block_until_ready(ca_layer(x2, w1, b1, w2, b2))
    assert jnp.allclose(out2, ref2, atol=1e-5, rtol=1e-5)

    print("KERNEL_OK")
</pallas_src>

<mosaic_0001>
module attributes {stable_mosaic.version = 11 : i64} {
  func.func @_ca_kernel_fused(%arg0: i32, %arg1: memref<1x64x256xf32, #tpu.memory_space<vmem>>, %arg2: memref<64x4xf32, #tpu.memory_space<vmem>>, %arg3: memref<1x4xf32, #tpu.memory_space<vmem>>, %arg4: memref<4x64xf32, #tpu.memory_space<vmem>>, %arg5: memref<1x64xf32, #tpu.memory_space<vmem>>, %arg6: memref<1x64x256xf32, #tpu.memory_space<vmem>>) attributes {dimension_semantics = [#tpu.dimension_semantics<parallel>], iteration_bounds = array<i64: 2>, scalar_prefetch = 0 : i64, scratch_operands = 0 : i64, tpu.core_type = #tpu.core_type<tc>, window_params = [{transform_indices = @transform_0, window_bounds = array<i64: 1, 64, 256>}, {pipeline_mode = #tpu.pipeline_mode<synchronous>, transform_indices = @transform_1, window_bounds = array<i64: 64, 4>}, {pipeline_mode = #tpu.pipeline_mode<synchronous>, transform_indices = @transform_2, window_bounds = array<i64: 1, 4>}, {pipeline_mode = #tpu.pipeline_mode<synchronous>, transform_indices = @transform_3, window_bounds = array<i64: 4, 64>}, {pipeline_mode = #tpu.pipeline_mode<synchronous>, transform_indices = @transform_4, window_bounds = array<i64: 1, 64>}, {transform_indices = @transform_5, window_bounds = array<i64: 1, 64, 256>}]} {
    %c0 = arith.constant 0 : index
    %c0_0 = arith.constant 0 : index
    %c0_1 = arith.constant 0 : index
    %0 = vector.load %arg1[%c0, %c0_0, %c0_1] : memref<1x64x256xf32, #tpu.memory_space<vmem>>, vector<1x64x256xf32>
    %cst = arith.constant dense<0.000000e+00> : vector<1x64xf32>
    %1 = vector.multi_reduction <add>, %0, %cst [2] : vector<1x64x256xf32> to vector<1x64xf32>
    %cst_2 = arith.constant 3.906250e-03 : f32
    %2 = vector.broadcast %cst_2 : f32 to vector<1x64xf32>
    %3 = arith.mulf %1, %2 : vector<1x64xf32>
    %c0_3 = arith.constant 0 : index
    %c0_4 = arith.constant 0 : index
    %4 = vector.load %arg2[%c0_3, %c0_4] : memref<64x4xf32, #tpu.memory_space<vmem>>, vector<64x4xf32>
    %cst_5 = arith.constant dense<0.000000e+00> : vector<1x4xf32>
    %5 = tpu.matmul %3, %4, %cst_5 {dimension_numbers = #tpu.dot_dimension_numbers<[1], [0], [0], [1], [0, 0, 1, 1], [], []>} : vector<1x64xf32>, vector<64x4xf32>, vector<1x4xf32> -> vector<1x4xf32>
    %c0_6 = arith.constant 0 : index
    %c0_7 = arith.constant 0 : index
    %6 = vector.load %arg3[%c0_6, %c0_7] : memref<1x4xf32, #tpu.memory_space<vmem>>, vector<1x4xf32>
    %7 = arith.addf %5, %6 : vector<1x4xf32>
    %cst_8 = arith.constant 0.000000e+00 : f32
    %8 = vector.broadcast %cst_8 : f32 to vector<1x4xf32>
    %9 = arith.cmpf oge, %7, %8 : vector<1x4xf32>
    %cst_9 = arith.constant 2.000000e-01 : f32
    %10 = vector.broadcast %cst_9 : f32 to vector<1x4xf32>
    %11 = arith.mulf %10, %7 : vector<1x4xf32>
    %12 = arith.select %9, %7, %11 : vector<1x4xi1>, vector<1x4xf32>
    %c0_10 = arith.constant 0 : index
    %c0_11 = arith.constant 0 : index
    %13 = vector.load %arg4[%c0_10, %c0_11] : memref<4x64xf32, #tpu.memory_space<vmem>>, vector<4x64xf32>
    %cst_12 = arith.constant dense<0.000000e+00> : vector<1x64xf32>
    %14 = tpu.matmul %12, %13, %cst_12 {dimension_numbers = #tpu.dot_dimension_numbers<[1], [0], [0], [1], [0, 0, 1, 1], [], []>} : vector<1x4xf32>, vector<4x64xf32>, vector<1x64xf32> -> vector<1x64xf32>
    %c0_13 = arith.constant 0 : index
    %c0_14 = arith.constant 0 : index
    %15 = vector.load %arg5[%c0_13, %c0_14] : memref<1x64xf32, #tpu.memory_space<vmem>>, vector<1x64xf32>
    %16 = arith.addf %14, %15 : vector<1x64xf32>
    %17 = arith.negf %16 : vector<1x64xf32>
    %18 = math.exp %17 : vector<1x64xf32>
    %cst_15 = arith.constant 1.000000e+00 : f32
    %19 = vector.broadcast %cst_15 : f32 to vector<1x64xf32>
    %20 = arith.addf %19, %18 : vector<1x64xf32>
    %21 = arith.divf %19, %20 : vector<1x64xf32>
    %22 = vector.shape_cast %21 : vector<1x64xf32> to vector<1x64x1xf32>
    %23 = vector.broadcast %22 : vector<1x64x1xf32> to vector<1x64x256xf32>
    %24 = arith.mulf %0, %23 : vector<1x64x256xf32>
    %c0_16 = arith.constant 0 : index
    %c0_17 = arith.constant 0 : index
    %c0_18 = arith.constant 0 : index
    %25 = vector.load %arg6[%c0_16, %c0_17, %c0_18] : memref<1x64x256xf32, #tpu.memory_space<vmem>>, vector<1x64x256xf32>
    tpu.vector_store %arg6[%c0_16, %c0_17, %c0_18], %24 {strides = array<i32>} : memref<1x64x256xf32, #tpu.memory_space<vmem>>, vector<1x64x256xf32>,
    return
  }
  func.func @transform_0(%arg0: i32) -> (i32, i32, i32) {
    %c0_i32 = arith.constant 0 : i32
    %c0_i32_0 = arith.constant 0 : i32
    %c0_i32_1 = arith.constant 0 : i32
    return %arg0, %c0_i32, %c0_i32_0 : i32, i32, i32
  }
  func.func @transform_1(%arg0: i32) -> (i32, i32) {
    %c0_i32 = arith.constant 0 : i32
    %c0_i32_0 = arith.constant 0 : i32
    %c0_i32_1 = arith.constant 0 : i32
    return %c0_i32, %c0_i32_0 : i32, i32
  }
  func.func @transform_2(%arg0: i32) -> (i32, i32) {
    %c0_i32 = arith.constant 0 : i32
    %c0_i32_0 = arith.constant 0 : i32
    %c0_i32_1 = arith.constant 0 : i32
    return %c0_i32, %c0_i32_0 : i32, i32
  }
  func.func @transform_3(%arg0: i32) -> (i32, i32) {
    %c0_i32 = arith.constant 0 : i32
    %c0_i32_0 = arith.constant 0 : i32
    %c0_i32_1 = arith.constant 0 : i32
    return %c0_i32, %c0_i32_0 : i32, i32
  }
  func.func @transform_4(%arg0: i32) -> (i32, i32) {
    %c0_i32 = arith.constant 0 : i32
    %c0_i32_0 = arith.constant 0 : i32
    %c0_i32_1 = arith.constant 0 : i32
    return %c0_i32, %c0_i32_0 : i32, i32
  }
  func.func @transform_5(%arg0: i32) -> (i32, i32, i32) {
    %c0_i32 = arith.constant 0 : i32
    %c0_i32_0 = arith.constant 0 : i32
    %c0_i32_1 = arith.constant 0 : i32
    return %arg0, %c0_i32, %c0_i32_0 : i32, i32, i32
  }
}

</mosaic_0001>

<bundles_post_ra>
// kernel: tpu_custom_call.1
= control target key start
LH: loop header
LB: loop body
LE: loop exit
PB: predicated region body
PF: predicated region fallthrough
CT: control target
= control target key end

     0   :  { %10 = vsyncpa [#allocation3], 0  ;;  %s1234_s0 = inlined_call_operand.hbm [shape: f32[2,64,256], index: 0, kind: input, shape index: {}]   ;;  %s1235_s1 = inlined_call_operand.vmem [shape: f32[64,4], index: 1, kind: input, shape index: {}]   ;;  %s1236_s2 = inlined_call_operand.vmem [shape: f32[1,4], index: 2, kind: input, shape index: {}]   ;;  %s1237_s3 = inlined_call_operand.vmem [shape: f32[4,64], index: 3, kind: input, shape index: {}]   ;;  %s1238_s4 = inlined_call_operand.vmem [shape: f32[1,64], index: 4, kind: input, shape index: {}]   ;;  %s1239_s5 = inlined_call_operand.hbm [shape: f32[2,64,256], index: 5, kind: output, shape index: {}]  }
   0x1   :  { %12 = vsyncpa [#allocation3 + $0x1], 0 }
   0x2   :  { %13 = vsyncpa [#allocation4], 0 }
   0x3   :  { %15 = vsyncpa [#allocation4 + $0x1], 0  ;;  %s940_s18 = smov 0   ;;  %s942_s19 = smov 0  }
   0x4   :  { %s944_s20 = smov 0   ;;  %s946_s21 = smov 0  }
   0x5 LB: > { %s961_s22 = sadd.s32 4294967295, %s899_s21   ;;  %s679_s23 = sadd.s32 4294967294, %s899_s21   ;;  %s899_s21 = sphi %s946_s21, %s1252_s21   ;;  %s895_s20 = sphi %s944_s20, %s1251_s20   ;;  %s891_s19 = sphi %s942_s19, %s1250_s19   ;;  %s887_s18 = sphi %s940_s18, %s1249_s18  }
   0x6   : > { %s965_s24 = sadd.s32 1, %s899_s21   ;;  %s28_s25 = sadd.s32 1, %s895_s20 }
   0x7   : > { %s25_s26 = ssub.s32 %s899_s21, %s965_s24  ;;  %p35_p0 = scmp.ne.s32.totalorder %s895_s20, %s891_s19 }
   0x8   : > { %p26_p1 = scmp.eq.s32.totalorder %s25_s26, 0  ;;  %p36_p2 = scmp.eq.s32.totalorder %s899_s21, 0 }
   0x9   : > { %p41_p3 = scmp.ne.s32.totalorder %s891_s19, %s887_s18  ;;  %p42_p4 = scmp.eq.s32.totalorder %s961_s22, 0 }
   0xa   : > { %s977_s27 = scalar_select %p26_p1, %s895_s20, %s28_s25  }
   0xb   : > { %p979_p5 = por %p36_p2, %p35_p0  ;;  %p983_p6 = por %p42_p4, %p41_p3 }
   0xc   : > { %p149_p7 = scmp.eq.s32.totalorder %s961_s22, 1  ;;  %p155_p8 = scmp.eq.s32.totalorder %s679_s23, 1 }
   0xd   : > { %p758_p10 = scmp.lt.s32.totalorder %s899_s21, 2  ;;  %s187_s7 = sand.u32 1, %s895_s20  }
   0xe   : > { %p990_p11 = por %p149_p7, %p35_p0  ;;  %p994_p12 = por %p155_p8, %p41_p3 }
   0xf   : > { %s697_s8 = sshll.u32 %s899_s21, 11  ;;  %s682_s9 = sshll.u32 %s187_s7, 7 }
  0x10   : > { %s1243_s30 = scalar_select %p990_p11, 1, 0 }
  0x11   : > { %s1244_s6 = scalar_select %p994_p12, 1, 0 }
  0x12   : > { %s1003_s12 = scalar_lea.hbm %s1234_s0, %s697_s8  ;;  %s191_s13 = scalar_lea.vmem [#allocation2], %s682_s9 }
  0x13   : > { %s198_s14 = sshll.u32 %s191_s13, 4  ;;  %p1007_p13 = pnand %p758_p10, %p979_p5  ;;  %s1011_s14 = int_to_ptr.vmem [resolvable:$true] %s198_s14 }
  0x14   : > { %s1013_s16 = scalar_lea.sflag [#allocation3], %s187_s7  ;;  %s803_s17 = scalar_lea.hbm %s1003_s12, 2048 }
  0x15   : > { %p804_p0 = scmp.ne.s32.totalorder %s1003_s12, %s803_s17  ;;  %p805_p1 = pneg %p1007_p13 }
  0x16   : > { %s808_s26 = scalar_lea.hbm %s1234_s0, 4096  ;;  %p809_p4 = scmp.lt.u32.totalorder %s1003_s12, %s1234_s0 }
  0x17   : > { %p806_p2 = pnand %p805_p1, %p804_p0  ;;  %p810_p5 = scmp.lt.u32.totalorder %s808_s26, %s803_s17 }
  0x18   : > { %p812_p8 = scmp.lt.u32.totalorder %s803_s17, %s1003_s12 }
  0x19   : > { %p807_p3 = pneg %p806_p2  ;;  %p811_p7 = por %p810_p5, %p809_p4 }
  0x1b   : > { %p813_p10 = por %p812_p8, %p811_p7 }
  0x1d   : > { %p814_p9 = pnand %p813_p10, %p807_p3 }
  0x1f   : > { %817 = shalt.err (!%p814_p9)
}
  0x20   : > { %s818_s7 = scalar_lea.vmem %s1011_s14, 2048  ;;  %s901_s9 = smov [#allocation2]  }
  0x21   : > { %p819_p0 = scmp.ne.s32.totalorder %s1011_s14, %s818_s7  ;;  %s823_s10 = sshll.u32 %s901_s9, 4  ;;  %s824_s10 = int_to_ptr.vmem [resolvable:$false] %s823_s10 }
  0x22   : > { %s825_s11 = scalar_lea.vmem %s824_s10, 4096  ;;  %p826_p11 = scmp.lt.s32.totalorder %s1011_s14, %s824_s10 }
  0x23   : > { %p821_p2 = pnand %p819_p0, %p805_p1  ;;  %p827_p4 = scmp.lt.s32.totalorder %s825_s11, %s818_s7 }
  0x25   : > { %p822_p12 = pneg %p821_p2  ;;  %p828_p5 = por %p827_p4, %p826_p11 }
  0x27   : > { %p829_p7 = pnand %p828_p5, %p822_p12 }
  0x29   : > { %832 = shalt.err (!%p829_p7)
}
  0x2a   : > { %s902_s13 = smov 256   ;;  %s903_s17 = smov 16  }
  0x2b   : > { %753 = dma.hbm_to_vmem [thread:$0]  (!%p1007_p13), %s1003_s12, 2048, %s1011_s14, %s1013_s16, %s902_s13, %s902_s13, %s903_s17  }
  0x2c   : > { %p685_p9 = scmp.ge.s32.totalorder %s899_s21, 1  ;;  %p206_p1 = scmp.lt.s32.totalorder %s899_s21, 3 }
  0x2e   : > { %p207_p3 = pnand %p685_p9, %p206_p1 }
  0x2f   : > { %s1044_s23 = sand.u32 (!%p207_p3), 1, %s891_s19  }
  0x30   : > { %210 = sbr.rel (%p207_p3) target bundleno = 826 (0x33a), region = 40  ;;  %s686_s25 = sshll.u32 (!%p207_p3), %s1044_s23, 7 }
  0x31   : > { %s213_s26 = scalar_lea.sflag (!%p207_p3), [#allocation3], %s1044_s23  ;;  %s216_s28 = scalar_lea.vmem (!%p207_p3), [#allocation2], %s686_s25 }
  0x37   : > { %878 = dma.done.wait (%p983_p6), %s213_s26, 2048  }
  0x38   : > { %880 = vsyncadd (%p983_p6), %s213_s26, 4294965248  ;;  %v1054_v0 = vld [vmem:[%s216_s28] sm:$0xff]  ;;  %v1056_v1 = vld [vmem:[%s216_s28 + $0x8] sm:$0xff]  ;;  %v904_v27 = vmov 0.0|0.0   ;;  %vm905_vm0 = vmmov 0   ;;  %v906_v37 = vmov 0.0   ;;  %v308_v38 = vlaneseq }
  0x39   : > { %v1058_v2 = vld [vmem:[%s216_s28 + $0x20] sm:$0xff]  ;;  %v259_v3 = vadd.f32 %v1056_v1, %v1054_v0  ;;  %v1062_v4 = vld [vmem:[%s216_s28 + $0x28] sm:$0xff]  ;;  %v1064_v5 = vld [vmem:[%s216_s28 + $0x10] sm:$0xff]  ;;  %734 = vmatprep.subr.bf16.mxu0 %v904_v27  ;;  %726 = vmatprep.mubr.msk.f32.mxu0 %vm905_vm0, %v906_v37  ;;  %vm319_vm1 = vcmask 130112   ;;  %vm326_vm2 = vcmask 195712   ;;  %vm333_vm3 = vcmask 261312  }
  0x3a   : > { %v1066_v6 = vld [vmem:[%s216_s28 + $0x18] sm:$0xff]  ;;  %v265_v7 = vadd.f32 %v1062_v4, %v1058_v2  ;;  %v1070_v8 = vld [vmem:[%s216_s28 + $0x30] sm:$0xff]  ;;  %v1078_v12 = vld [vmem:[%s216_s28 + $0x40] sm:$0xff]  ;;  %729 = vmatprep.subr.mxu1 %v906_v37  ;;  %731 = vmatprep.mubr.msk.f32.mxu1 %vm905_vm0, %v906_v37  ;;  %v309_v39 = vand.u32 127, %v308_v38  ;;  %v1126_v40 = vshrl.u32 %v308_v38, 7  ;;  %vm340_vm4 = vcmask 326912  }
  0x3b   : > { %v1072_v9 = vld [vmem:[%s216_s28 + $0x38] sm:$0xff]  ;;  %260 = vadd.xlane.f32.xlu0 %v259_v3  ;;  %v262_v10 = vadd.f32 %v1066_v6, %v1064_v5  ;;  %v1080_v13 = vld [vmem:[%s216_s28 + $0x48] sm:$0xff]  ;;  %v1082_v14 = vld [vmem:[%s216_s28 + $0x50] sm:$0xff]  ;;  %vm347_vm5 = vcmask 392512   ;;  %vm354_vm6 = vcmask 458112   ;;  %vm361_vm7 = vcmask 523712  }
  0x3c   : > { %266 = vadd.xlane.f32.xlu1 %v265_v7  ;;  %v268_v11 = vadd.f32 %v1072_v9, %v1070_v8  ;;  %v1084_v15 = vld [vmem:[%s216_s28 + $0x58] sm:$0xff]  ;;  %v271_v16 = vadd.f32 %v1080_v13, %v1078_v12  ;;  %v1090_v18 = vld [vmem:[%s216_s28 + $0x60] sm:$0xff]  ;;  %v1092_v19 = vld [vmem:[%s216_s28 + $0x68] sm:$0xff]  ;;  %v314_v41 = vadd.s32 4294967288, %v309_v39  ;;  %v321_v43 = vadd.s32 4294967280, %v309_v39  ;;  %s1153_s10 = scalar_lea.vmem [#allocation5], %s686_s25 }
  0x3d   : > { %v274_v17 = vadd.f32 %v1084_v15, %v1082_v14  ;;  %v1094_v20 = vld [vmem:[%s216_s28 + $0x70] sm:$0xff]  ;;  %v1096_v21 = vld [vmem:[%s216_s28 + $0x78] sm:$0xff]  ;;  %v277_v22 = vadd.f32 %v1092_v19, %v1090_v18  ;;  %v291_v24 = vld [vmem:[%s1235_s1] sm:$0xff]  ;;  %v328_v44 = vadd.s32 4294967272, %v309_v39  ;;  %v312_v46 = vsub.s32 %v309_v39, %v1126_v40  ;;  %s698_s25 = sshll.u32 %s961_s22, 11  ;;  %s606_s11 = sshll.u32 %s1153_s10, 4  ;;  %s1186_s11 = int_to_ptr.vmem [resolvable:$true] %s606_s11 }
  0x3e   : > { %v280_v23 = vadd.f32 %v1096_v21, %v1094_v20  ;;  %v292_v25 = vld [vmem:[%s1235_s1 + $0x8] sm:$0xff]  ;;  %v293_v28 = vld [vmem:[%s1235_s1 + $0x10] sm:$0xff]  ;;  %v294_v29 = vld [vmem:[%s1235_s1 + $0x18] sm:$0xff]  ;;  %v317_v48 = vsub.s32 %v314_v41, %v1126_v40  ;;  %v335_v49 = vadd.s32 4294967264, %v309_v39  ;;  %v324_v50 = vsub.s32 %v321_v43, %v1126_v40  ;;  %s1184_s26 = scalar_lea.hbm %s1239_s5, %s698_s25  ;;  %s593_s22 = scalar_lea.sflag [#allocation4], %s1044_s23 }
  0x3f   : > { %263 = vadd.xlane.f32.xlu0 %v262_v10  ;;  %v735_v26 = vpack.c.bf16 %v292_v25, %v291_v24  ;;  %v738_v30 = vpack.c.bf16 %v294_v29, %v293_v28  ;;  %v295_v31 = vld [vmem:[%s1235_s1 + $0x20] sm:$0xff]  ;;  %v296_v32 = vld [vmem:[%s1235_s1 + $0x28] sm:$0xff]  ;;  %v297_v34 = vld [vmem:[%s1235_s1 + $0x30] sm:$0xff]  ;;  %v331_v53 = vsub.s32 %v328_v44, %v1126_v40  ;;  %v342_v54 = vadd.s32 4294967256, %v309_v39  ;;  %s833_s28 = scalar_lea.vmem %s1186_s11, 2048  ;;  %p1246_p11 = scmp.ne.s32.totalorder %s1243_s30, 0 }
  0x40   : > { %269 = vadd.xlane.f32.xlu1 %v268_v11  ;;  %v741_v33 = vpack.c.bf16 %v296_v32, %v295_v31  ;;  %v298_v35 = vld [vmem:[%s1235_s1 + $0x38] sm:$0xff]  ;;  %v338_v60 = vsub.s32 %v335_v49, %v1126_v40  ;;  %v349_v61 = vadd.s32 4294967248, %v309_v39  ;;  %v356_v10 = vadd.s32 4294967240, %v309_v39  ;;  %v439_v39 = vld [vmem:[%s1237_s3] sm:$0xf]  ;;  %p834_p6 = scmp.ne.s32.totalorder %s1186_s11, %s833_s28  ;;  %s907_s29 = smov [#allocation5]  }
  0x41   : > { %736 = vmatpush3.bf16.msra.mxu0 %v735_v26  ;;  %v744_v36 = vpack.c.bf16 %v298_v35, %v297_v34  ;;  %v345_v7 = vsub.s32 %v342_v54, %v1126_v40  ;;  %vm363_vm8 = vcmask 523264   ;;  %vm445_vm9 = vcmask 1043456   ;;  %v299_v41 = vld [vmem:[%s1236_s2] sm:$0x1]  ;;  %s837_s12 = sshll.u32 %s907_s29, 4  ;;  %s838_s12 = int_to_ptr.vmem [resolvable:$false] %s837_s12 }
  0x42   : > { %737 = vmatprep.subr.bf16.mxu0 %v904_v27  ;;  %v352_v26 = vsub.s32 %v349_v61, %v1126_v40  ;;  %v359_v29 = vsub.s32 %v356_v10, %v1126_v40  ;;  %730 = vmatpush3.msk.msra.mxu1 %vm445_vm9, %v439_v39  ;;  %vm441_vm11 = vcmask 31744   ;;  %v527_v54 = vsub.s32 0, %v1126_v40  ;;  %p835_p12 = pnand %p834_p6, %p1246_p11  ;;  %s839_s14 = scalar_lea.vmem %s838_s12, 4096 }
  0x43   : > { %272 = vadd.xlane.f32.xlu0 %v271_v16  ;;  %p840_p8 = scmp.lt.s32.totalorder %s1186_s11, %s838_s12  ;;  %p841_p10 = scmp.lt.s32.totalorder %s839_s14, %s833_s28 }
  0x44   : > { %275 = vadd.xlane.f32.xlu1 %v274_v17  ;;  %p836_p13 = pneg %p835_p12 }
  0x45   : > { %739 = vmatpush3.bf16.msra.mxu0 %v738_v30  ;;  %p842_p0 = por %p841_p10, %p840_p8 }
  0x46   : > { %740 = vmatprep.subr.bf16.mxu0 %v904_v27 }
  0x47   : > { %278 = vadd.xlane.f32.xlu0 %v277_v22  ;;  %p843_p2 = pnand %p842_p0, %p836_p13 }
  0x48   : > { %281 = vadd.xlane.f32.xlu1 %v280_v23 }
  0x49   : > { %742 = vmatpush3.bf16.msra.mxu0 %v741_v33 }
  0x4a   : > { %743 = vmatprep.subr.bf16.mxu0 %v904_v27 }
  0x4d   : > { %745 = vmatpush3.bf16.msra.mxu0 %v744_v36 }
  0xc8   : > { %v261_v42 = vpop.xlane.xlu0 %260 }
  0xc9   : > { %v267_v45 = vpop.xlane.xlu1 %266  ;;  %v283_v47 = vmul.f32 0.00390625, %v261_v42 }
  0xca   : > { %v285_v51 = vmul.f32 0.00390625, %v267_v45 }
  0xcb   : > { %v313_v58 = vrot.slane %v283_v47, %v312_v46  ;;  %v440_v47 = vld [vmem:[%s1238_s4] sm:$0x1] }
  0xcc   : > { %v264_v52 = vpop.xlane.xlu0 %263  ;;  %v325_v62 = vrot.slane %v285_v51, %v324_v50 }
  0xcd   : > { %v284_v55 = vmul.f32 0.00390625, %v264_v52  ;;  %v270_v56 = vpop.xlane.xlu1 %269 }
  0xce   : > { %v286_v57 = vmul.f32 0.00390625, %v270_v56 }
  0xcf   : > { %v318_v59 = vrot.slane %v284_v55, %v317_v48 }
  0xd0   : > { %v332_v63 = vrot.slane %v286_v57, %v331_v53  ;;  %v273_v3 = vpop.xlane.xlu0 %272 }
  0xd1   : > { %v320_v11 = vsel %vm319_vm1, %v318_v59, %v313_v58  ;;  %v287_v16 = vmul.f32 0.00390625, %v273_v3  ;;  %v276_v17 = vpop.xlane.xlu1 %275 }
  0xd2   : > { %v327_v22 = vsel %vm326_vm2, %v325_v62, %v320_v11  ;;  %v288_v23 = vmul.f32 0.00390625, %v276_v17 }
  0xd3   : > { %v334_v24 = vsel %vm333_vm3, %v332_v63, %v327_v22  ;;  %v339_v25 = vrot.slane %v287_v16, %v338_v60 }
  0xd4   : > { %v346_v27 = vrot.slane %v288_v23, %v345_v7  ;;  %v279_v28 = vpop.xlane.xlu0 %278 }
  0xd5   : > { %v341_v30 = vsel %vm340_vm4, %v339_v25, %v334_v24  ;;  %v289_v31 = vmul.f32 0.00390625, %v279_v28  ;;  %v282_v32 = vpop.xlane.xlu1 %281 }
  0xd6   : > { %v290_v33 = vmul.f32 0.00390625, %v282_v32  ;;  %v348_v35 = vsel %vm347_vm5, %v346_v27, %v341_v30 }
  0xd7   : > { %v353_v34 = vrot.slane %v289_v31, %v352_v26 }
  0xd8   : > { %v360_v36 = vrot.slane %v290_v33, %v359_v29 }
  0xd9   : > { %v355_v37 = vsel %vm354_vm6, %v353_v34, %v348_v35 }
  0xda   : > { %v362_v38 = vsel %vm361_vm7, %v360_v36, %v355_v37 }
  0xdb   : > { %727 = vmatmul.mubr.msk.f32.vlgmr.msra.gmra.mrb[0].mxu0 %vm363_vm8, %v362_v38 }
 0x1ae   : > { %v432_v42 = vpop.f32.mrb[0].mxu0 }
 0x1af   : > { %v433_v43 = vadd.f32 %v432_v42, %v299_v41  ;;  %v728_v44 = vpop.f32.mrb[1].mxu0 }
 0x1b1   : > { %vm436_vm10 = vcmp.ge.f32.partialorder %v433_v43, 0.0  ;;  %v437_v45 = vmul.f32 0.2, %v433_v43 }
 0x1b3   : > { %v438_v46 = vsel %vm436_vm10, %v433_v43, %v437_v45 }
 0x1b4   : > { %732 = vmatmul.mubr.msk.f32.vlgmr.msra.gmra.mrb[0].mxu1 %vm441_vm11, %v438_v46 }
 0x287   : > { %v515_v48 = vpop.f32.mrb[0].mxu1 }
 0x288   : > { %v516_v49 = vadd.f32 %v515_v48, %v440_v47  ;;  %v733_v50 = vpop.f32.mrb[1].mxu1 }
 0x28a   : > { %v691_v51 = vmul.f32 -1.442695, %v516_v49 }
 0x28c   : > { %799 = vpow2.f32 %v691_v51 }
 0x296   : > { %v800_v52 = vpop.eup %799 }
 0x297   : > { %v522_v53 = vadd.f32 1.0, %v800_v52 }
 0x299   : > { %801 = vrcp.f32 %v522_v53 }
 0x2a3   : > { %v802_v55 = vpop.eup %801 }
 0x2a4   : > { %v528_v56 = vrot.slane %v802_v55, %v527_v54 }
 0x2a6   : > { %534 = vbcast.lane.b32.xlu1 %v528_v56, 264  ;;  %530 = vbcast.lane.b32.xlu0 %v528_v56, 256 }
 0x2aa   : > { %538 = vbcast.lane.b32.xlu1 %v528_v56, 272  ;;  %546 = vbcast.lane.b32.xlu0 %v528_v56, 288 }
 0x2ae   : > { %542 = vbcast.lane.b32.xlu1 %v528_v56, 280  ;;  %554 = vbcast.lane.b32.xlu0 %v528_v56, 304 }
 0x2b2   : > { %550 = vbcast.lane.b32.xlu1 %v528_v56, 296 }
 0x2b6   : > { %558 = vbcast.lane.b32.xlu1 %v528_v56, 312 }
 0x318   : > { %v535_v57 = vpop.permute.xlu1 %534  ;;  %v531_v58 = vpop.permute.xlu0 %530 }
 0x319   : > { %v562_v59 = vmul.f32 %v535_v57, %v1064_v5  ;;  %v563_v60 = vmul.f32 %v535_v57, %v1066_v6  ;;  %v560_v61 = vmul.f32 %v531_v58, %v1054_v0  ;;  %v561_v40 = vmul.f32 %v531_v58, %v1056_v1 }
 0x31b   : > { %578 = vst [vmem:[%s1153_s10 + $0x10] sm:$0xff] %v562_v59  ;;  %579 = vst [vmem:[%s1153_s10 + $0x18] sm:$0xff] %v563_v60 }
 0x31c   : > { %576 = vst [vmem:[%s1153_s10] sm:$0xff] %v560_v61  ;;  %577 = vst [vmem:[%s1153_s10 + $0x8] sm:$0xff] %v561_v40  ;;  %v539_v5 = vpop.permute.xlu1 %538  ;;  %v547_v0 = vpop.permute.xlu0 %546 }
 0x31d   : > { %v564_v1 = vmul.f32 %v539_v5, %v1058_v2  ;;  %v565_v6 = vmul.f32 %v539_v5, %v1062_v4  ;;  %v568_v62 = vmul.f32 %v547_v0, %v1078_v12  ;;  %v569_v63 = vmul.f32 %v547_v0, %v1080_v13 }
 0x31f   : > { %580 = vst [vmem:[%s1153_s10 + $0x20] sm:$0xff] %v564_v1  ;;  %581 = vst [vmem:[%s1153_s10 + $0x28] sm:$0xff] %v565_v6 }
 0x320   : > { %584 = vst [vmem:[%s1153_s10 + $0x40] sm:$0xff] %v568_v62  ;;  %585 = vst [vmem:[%s1153_s10 + $0x48] sm:$0xff] %v569_v63  ;;  %v543_v3 = vpop.permute.xlu1 %542  ;;  %v555_v7 = vpop.permute.xlu0 %554 }
 0x321   : > { %v566_v2 = vmul.f32 %v543_v3, %v1070_v8  ;;  %v567_v10 = vmul.f32 %v543_v3, %v1072_v9  ;;  %v572_v4 = vmul.f32 %v555_v7, %v1090_v18  ;;  %v573_v12 = vmul.f32 %v555_v7, %v1092_v19 }
 0x323   : > { %582 = vst [vmem:[%s1153_s10 + $0x30] sm:$0xff] %v566_v2  ;;  %583 = vst [vmem:[%s1153_s10 + $0x38] sm:$0xff] %v567_v10 }
 0x324   : > { %588 = vst [vmem:[%s1153_s10 + $0x60] sm:$0xff] %v572_v4  ;;  %589 = vst [vmem:[%s1153_s10 + $0x68] sm:$0xff] %v573_v12  ;;  %v551_v13 = vpop.permute.xlu1 %550 }
 0x325   : > { %v570_v11 = vmul.f32 %v551_v13, %v1082_v14  ;;  %v571_v16 = vmul.f32 %v551_v13, %v1084_v15 }
 0x327   : > { %586 = vst [vmem:[%s1153_s10 + $0x50] sm:$0xff] %v570_v11  ;;  %587 = vst [vmem:[%s1153_s10 + $0x58] sm:$0xff] %v571_v16 }
 0x328   : > { %v559_v8 = vpop.permute.xlu1 %558 }
 0x329   : > { %v574_v9 = vmul.f32 %v559_v8, %v1094_v20  ;;  %v575_v14 = vmul.f32 %v559_v8, %v1096_v21 }
 0x32b   : > { %590 = vst [vmem:[%s1153_s10 + $0x70] sm:$0xff] %v574_v9  ;;  %591 = vst [vmem:[%s1153_s10 + $0x78] sm:$0xff] %v575_v14 }
 0x32c   : > { %846 = shalt.err (!%p843_p2)
}
 0x32d   : > { %s847_s15 = scalar_lea.hbm %s1184_s26, 2048  ;;  %s851_s7 = scalar_lea.hbm %s1239_s5, 4096 }
 0x32e   : > { %p848_p4 = scmp.ne.s32.totalorder %s1184_s26, %s847_s15  ;;  %p852_p9 = scmp.lt.u32.totalorder %s1184_s26, %s1239_s5 }
 0x32f   : > { %p853_p1 = scmp.lt.u32.totalorder %s851_s7, %s847_s15  ;;  %p855_p6 = scmp.lt.u32.totalorder %s847_s15, %s1184_s26 }
 0x330   : > { %p849_p5 = pnand %p848_p4, %p1246_p11 }
 0x331   : > { %p854_p3 = por %p853_p1, %p852_p9 }
 0x332   : > { %p850_p7 = pneg %p849_p5 }
 0x333   : > { %p856_p12 = por %p855_p6, %p854_p3 }
 0x335   : > { %p857_p13 = pnand %p856_p12, %p850_p7 }
 0x337   : > { %860 = shalt.err (!%p857_p13)
}
 0x338   : > { %s908_s25 = smov 256   ;;  %s909_s13 = smov 16  }
 0x339   : > { %748 = dma.vmem_to_hbm [thread:$0]  (%p1246_p11), %s1186_s11, 2048, %s1184_s26, %s593_s22, %s908_s25, %s908_s25, %s909_s13  }
 0x33a PF: > { %s621_s17 = sand.u32 1, %s887_s18   ;;  %p1247_p8 = scmp.ne.s32.totalorder %s1244_s6, 0 }
 0x33b   : > { %p1248_p10 = scmp.ge.s32.totalorder %s899_s21, 2  ;;  %s622_s28 = scalar_lea.sflag [#allocation4], %s621_s17 }
 0x33d   : > { %p755_p0 = pnand %p1248_p10, %p1247_p8 }
 0x33f   : > { %882 = dma.done.wait (!%p755_p0), %s622_s28, 2048  }
 0x340   : > { %884 = vsyncadd (!%p755_p0), %s622_s28, 4294965248  ;;  %p18_p2 = scmp.ge.s32.totalorder %s965_s24, 4   ;;  %s1249_s18 = smov %s891_s19 }
 0x341   : > { %s1250_s19 = smov %s895_s20  ;;  %s1251_s20 = smov %s977_s27 }
 0x342   : > { %s1252_s21 = smov %s965_s24  ;;  %20 = sbr.rel (!%p18_p2) target bundleno = 5 (0x5), region = 85 }
 0x349   :  { %627 = vsyncpa [#allocation3], 1 }
 0x34a   :  { %629 = vsyncpa [#allocation3 + $0x1], 1 }
 0x34b   :  { %630 = vsyncpa [#allocation4], 1 }
 0x34c   :  { %632 = vsyncpa [#allocation4 + $0x1], 1 }

</bundles_post_ra>
